<compile_context>
chip_gen: v7x
topology: tpu7x:2x2x1
jax: 0.10.0
libtpu: 0.0.40
codegen_flags: <defaults>
</compile_context>

<pallas_src>
import jax
import jax.numpy as jnp
from jax.experimental import pallas as pl
from jax.experimental.pallas import tpu as pltpu

LANE = 128      # TPU lane width
SUBLANE = 8     # TPU sublane width


def _round_up(x, m):
    return (x + m - 1) // m * m


# ----------------------------------------------------------------------------
# Fused CBR kernel bodies (single MXU matmul + bias + ReLU, lane-dense stores).
# ----------------------------------------------------------------------------
def _cbr_kernel(p_ref, w_ref, b_ref, o_ref):
    """o = relu(p @ w + b)."""
    acc = jnp.dot(p_ref[...], w_ref[...], preferred_element_type=jnp.float32)
    o_ref[...] = jnp.maximum(acc + b_ref[...], 0.0).astype(o_ref.dtype)


def _cbr_residual_kernel(p_ref, w_ref, b_ref, r_ref, o_ref):
    """o = relu(p @ w + b) + r   (residual add fused into the epilogue)."""
    acc = jnp.dot(p_ref[...], w_ref[...], preferred_element_type=jnp.float32)
    y = jnp.maximum(acc + b_ref[...], 0.0) + r_ref[...].astype(jnp.float32)
    o_ref[...] = y.astype(o_ref.dtype)


def _cbr_concat2_kernel(p1_ref, p2_ref, w1_ref, w2_ref, b_ref, o_ref):
    """o = relu(p1 @ w1 + p2 @ w2 + b)  -- channel-concat fused as a split matmul."""
    acc = jnp.dot(p1_ref[...], w1_ref[...], preferred_element_type=jnp.float32)
    acc = acc + jnp.dot(p2_ref[...], w2_ref[...],
                        preferred_element_type=jnp.float32)
    o_ref[...] = jnp.maximum(acc + b_ref[...], 0.0).astype(o_ref.dtype)


# ----------------------------------------------------------------------------
# One fused CBR pallas_call: (M, Kd) @ (Kd, Cout) [+ second operand] [+ residual]
# ----------------------------------------------------------------------------
def _fused_cbr_call(patch_list, weight_list, bias, *, out_dtype, residual=None):
    """patch_list[i]: (M, Kd_i) activations (bf16); weight_list[i]: (Kd_i, Cout)
    BN-folded weights (bf16); bias: (Cout,) f32.  Returns (M, Cout) out_dtype."""
    assert len(patch_list) == len(weight_list) and len(patch_list) in (1, 2)
    M = patch_list[0].shape[0]
    Cout = weight_list[0].shape[1]
    Cout_p = _round_up(Cout, LANE)                     # lane-dense output stores
    out_bytes = jnp.dtype(out_dtype).itemsize

    # Row tile: multiple of 16 (bf16 sublane pack), >=2 grid steps when possible
    # (v7x megacore sharding of the "parallel" axis), capped at 512 rows.
    tm = min(512, _round_up(max((M + 1) // 2, 16), 16))
    M_p = _round_up(M, tm)
    grid = (M_p // tm,)

    # Contraction dims only rounded to a sublane multiple (no 128 padding).
    kd_list = [_round_up(p.shape[1], SUBLANE) for p in patch_list]

    inputs, in_specs = [], []
    for p, kd in zip(patch_list, kd_list):
        inputs.append(jnp.pad(p, ((0, M_p - M), (0, kd - p.shape[1]))))
        in_specs.append(pl.BlockSpec((tm, kd), lambda i: (i, 0)))
    for w, kd in zip(weight_list, kd_list):
        inputs.append(jnp.pad(w, ((0, kd - w.shape[0]), (0, Cout_p - Cout))))
        in_specs.append(pl.BlockSpec((kd, Cout_p), lambda i: (0, 0)))   # resident
    inputs.append(jnp.pad(bias.reshape(1, Cout).astype(jnp.float32),
                          ((0, 0), (0, Cout_p - Cout))))
    in_specs.append(pl.BlockSpec((1, Cout_p), lambda i: (0, 0)))        # resident
    if residual is not None:
        inputs.append(jnp.pad(residual, ((0, M_p - M), (0, Cout_p - Cout))))
        in_specs.append(pl.BlockSpec((tm, Cout_p), lambda i: (i, 0)))

    if len(patch_list) == 2:
        assert residual is None
        body = _cbr_concat2_kernel
    elif residual is not None:
        body = _cbr_residual_kernel
    else:
        body = _cbr_kernel

    flops = 2 * M_p * Cout_p * sum(kd_list)
    bytes_accessed = (sum(int(a.size) * jnp.dtype(a.dtype).itemsize for a in inputs)
                      + M_p * Cout_p * out_bytes)

    # VMEM budget: double-buffered row-tiled operands + (worst case 2x) residents.
    vmem_bytes = (sum(2 * tm * kd * 2 for kd in kd_list)
                  + sum(2 * kd * Cout_p * 2 for kd in kd_list)
                  + 2 * Cout_p * 4
                  + (2 * tm * Cout_p * 2 if residual is not None else 0)
                  + 2 * tm * Cout_p * out_bytes)
    vmem_limit = int(min(max(4 * vmem_bytes, 32 * 1024 * 1024),
                         64 * 1024 * 1024))            # stay within v7x's 64 MiB

    out_p = pl.pallas_call(
        body,
        out_shape=jax.ShapeDtypeStruct((M_p, Cout_p), out_dtype),
        grid_spec=pltpu.PrefetchScalarGridSpec(
            num_scalar_prefetch=0,
            grid=grid,
            in_specs=in_specs,
            out_specs=pl.BlockSpec((tm, Cout_p), lambda i: (i, 0)),
        ),
        compiler_params=pltpu.CompilerParams(
            dimension_semantics=("parallel",),
            vmem_limit_bytes=vmem_limit),
        cost_estimate=pl.CostEstimate(flops=int(flops), transcendentals=0,
                                      bytes_accessed=int(bytes_accessed)),
    )(*inputs)

    return out_p[:M, :Cout]


# ----------------------------------------------------------------------------
# Layout prep (XLA side): BN folding + im2col in bf16.
# ----------------------------------------------------------------------------
def _fold_bn(weight_oihw, gamma, beta, mean, var, eps=1e-5):
    scale = gamma / jnp.sqrt(var + eps)                 # (Cout,)
    bias = beta - mean * scale                          # (Cout,)
    Cout, Cin, K, _ = weight_oihw.shape
    w_mat = jnp.transpose(weight_oihw, (2, 3, 1, 0)).reshape(K * K * Cin, Cout)
    return w_mat * scale[None, :], bias


def _im2col(x, K, stride, padding):
    """x: (N, H, W, C) -> patches (N*Ho*Wo, K*K*C), column order (kh, kw, c)."""
    N, H, W, C = x.shape
    Ho = (H + 2 * padding - K) // stride + 1
    Wo = (W + 2 * padding - K) // stride + 1
    if K == 1 and stride == 1 and padding == 0:
        return x.reshape(N * H * W, C), Ho, Wo
    xp = jnp.pad(x, ((0, 0), (padding, padding), (padding, padding), (0, 0))) \
        if padding > 0 else x
    span_h = (Ho - 1) * stride + 1
    span_w = (Wo - 1) * stride + 1
    cols = [xp[:, kh:kh + span_h:stride, kw:kw + span_w:stride, :]
            for kh in range(K) for kw in range(K)]
    patches = jnp.concatenate(cols, axis=-1).reshape(N * Ho * Wo, K * K * C)
    return patches, Ho, Wo


# ----------------------------------------------------------------------------
# CSP_layer0 forward (NCHW in / NCHW out, NHWC + bf16 internally).
# ----------------------------------------------------------------------------
def csp_layer0_forward(x_nchw, params, *, act_dtype=jnp.bfloat16):
    x = jnp.transpose(x_nchw, (0, 2, 3, 1)).astype(act_dtype)   # NHWC, bf16 early
    N = x.shape[0]

    folded = {}
    for name, p in params.items():
        w_mat, bias = _fold_bn(p["w"], p["gamma"], p["beta"], p["mean"], p["var"])
        folded[name] = dict(w=w_mat.astype(act_dtype), b=bias,
                            k=p["w"].shape[2], cout=p["w"].shape[0],
                            stride=p["stride"], padding=p["padding"])

    def cbr(name, inp, *, residual=None, out_dtype=act_dtype):
        f = folded[name]
        patches, Ho, Wo = _im2col(inp, f["k"], f["stride"], f["padding"])
        res = None
        if residual is not None:
            res = residual.reshape(-1, residual.shape[-1]).astype(act_dtype)
        y = _fused_cbr_call([patches], [f["w"]], f["b"],
                            out_dtype=out_dtype, residual=res)
        return y.reshape(N, Ho, Wo, f["cout"])

    x1 = cbr("conv1", x)
    x2 = cbr("conv2", x1)
    x3 = cbr("conv3", x2)
    x4 = cbr("conv4", x3)
    x5 = cbr("conv5", x4, residual=x3)          # x5 = relu(bn(conv(x4))) + x3 fused
    x6 = cbr("conv6", x5)
    xd6 = cbr("csp_dense", x2)

    # conv7 consumes concat([x6, xd6], channel) -- fused as a split 1x1 matmul.
    f7 = folded["conv7"]
    C6 = x6.shape[-1]
    p1 = x6.reshape(-1, C6)
    p2 = xd6.reshape(-1, xd6.shape[-1])
    y7 = _fused_cbr_call([p1, p2], [f7["w"][:C6], f7["w"][C6:]], f7["b"],
                         out_dtype=jnp.float32)
    x7 = y7.reshape(N, x6.shape[1], x6.shape[2], f7["cout"])
    return jnp.transpose(x7, (0, 3, 1, 2))      # -> NCHW


# ----------------------------------------------------------------------------
# Pure-JAX reference with matching precision (bf16 matmul inputs + bf16
# inter-layer activations, f32 accumulation) -- checks kernel correctness.
# ----------------------------------------------------------------------------
def _reference_cbr_nchw(x, p, *, eps=1e-5):
    scale = p["gamma"] / jnp.sqrt(p["var"] + eps)
    bias = p["beta"] - p["mean"] * scale
    w = (p["w"] * scale[:, None, None, None]).astype(jnp.bfloat16)
    y = jax.lax.conv_general_dilated(
        x.astype(jnp.bfloat16), w,
        window_strides=(p["stride"], p["stride"]),
        padding=((p["padding"], p["padding"]), (p["padding"], p["padding"])),
        dimension_numbers=("NCHW", "OIHW", "NCHW"),
        preferred_element_type=jnp.float32)
    return jnp.maximum(y + bias.reshape(1, -1, 1, 1), 0.0)


def _reference_csp_layer0(x, params):
    bf = lambda a: a.astype(jnp.bfloat16)
    r = lambda inp, name: _reference_cbr_nchw(inp, params[name])
    x1 = bf(r(x, "conv1"))
    x2 = bf(r(x1, "conv2"))
    x3 = bf(r(x2, "conv3"))
    x4 = bf(r(x3, "conv4"))
    x5 = bf(r(x4, "conv5") + x3.astype(jnp.float32))
    x6 = bf(r(x5, "conv6"))
    xd6 = bf(r(x2, "csp_dense"))
    x67 = jnp.concatenate([x6, xd6], axis=1)
    return r(x67, "conv7")


if __name__ == "__main__":
    # CSP_layer0(in_c=4, out_c=8) on a (2, 4, 16, 16) input.
    N, in_c, H, W = 2, 4, 16, 16
    out_c = 8
    outc2 = out_c // 2

    layer_defs = [
        #  name        cin        cout   k  stride pad
        ("conv1",      in_c,      outc2, 3, 1, 1),
        ("conv2",      outc2,     out_c, 3, 2, 1),
        ("conv3",      out_c,     out_c, 1, 1, 0),
        ("conv4",      out_c,     outc2, 1, 1, 0),
        ("conv5",      outc2,     out_c, 3, 1, 1),
        ("conv6",      out_c,     out_c, 1, 1, 0),
        ("csp_dense",  out_c,     out_c, 1, 1, 0),
        ("conv7",      out_c * 2, out_c, 1, 1, 0),
    ]

    key = jax.random.PRNGKey(0)
    keys = jax.random.split(key, len(layer_defs) + 1)
    x = jax.random.normal(keys[0], (N, in_c, H, W), dtype=jnp.float32)

    params = {}
    for k, (name, ci, co, ks, st, pad) in zip(keys[1:], layer_defs):
        kw_, kg, kb, km, kv = jax.random.split(k, 5)
        fan_in = ci * ks * ks
        params[name] = dict(
            w=jax.random.normal(kw_, (co, ci, ks, ks), jnp.float32)
              * (2.0 / fan_in) ** 0.5,
            gamma=1.0 + 0.1 * jax.random.normal(kg, (co,), jnp.float32),
            beta=0.1 * jax.random.normal(kb, (co,), jnp.float32),
            mean=0.1 * jax.random.normal(km, (co,), jnp.float32),
            var=1.0 + 0.1 * jax.random.uniform(kv, (co,), jnp.float32),
            stride=st, padding=pad,
        )

    fwd = jax.jit(lambda xin: csp_layer0_forward(xin, params))
    out = jax.block_until_ready(fwd(x))
    assert out.shape == (N, out_c, H // 2, W // 2), out.shape
    assert out.dtype == jnp.float32, out.dtype

    ref = jax.block_until_ready(_reference_csp_layer0(x, params))
    max_err = float(jnp.max(jnp.abs(out - ref)))
    assert jnp.allclose(out, ref, atol=2e-2, rtol=2e-2), max_err

    print("KERNEL_OK")
</pallas_src>

<mosaic_0001>
module attributes {stable_mosaic.version = 11 : i64} {
  func.func @_cbr_kernel(%arg0: i32, %arg1: memref<256x40xbf16, #tpu.memory_space<vmem>>, %arg2: memref<40x128xbf16, #tpu.memory_space<vmem>>, %arg3: memref<1x128xf32, #tpu.memory_space<vmem>>, %arg4: memref<256x128xbf16, #tpu.memory_space<vmem>>) attributes {dimension_semantics = [#tpu.dimension_semantics<parallel>], iteration_bounds = array<i64: 2>, scalar_prefetch = 0 : i64, scratch_operands = 0 : i64, tpu.core_type = #tpu.core_type<tc>, window_params = [{transform_indices = @transform_0, window_bounds = array<i64: 256, 40>}, {pipeline_mode = #tpu.pipeline_mode<synchronous>, transform_indices = @transform_1, window_bounds = array<i64: 40, 128>}, {pipeline_mode = #tpu.pipeline_mode<synchronous>, transform_indices = @transform_2, window_bounds = array<i64: 1, 128>}, {transform_indices = @transform_3, window_bounds = array<i64: 256, 128>}]} {
    %c0 = arith.constant 0 : index
    %c0_0 = arith.constant 0 : index
    %0 = vector.load %arg1[%c0, %c0_0] : memref<256x40xbf16, #tpu.memory_space<vmem>>, vector<256x40xbf16>
    %c0_1 = arith.constant 0 : index
    %c0_2 = arith.constant 0 : index
    %1 = vector.load %arg2[%c0_1, %c0_2] : memref<40x128xbf16, #tpu.memory_space<vmem>>, vector<40x128xbf16>
    %cst = arith.constant dense<0.000000e+00> : vector<256x128xf32>
    %2 = tpu.matmul %0, %1, %cst {dimension_numbers = #tpu.dot_dimension_numbers<[1], [0], [0], [1], [0, 0, 1, 1], [], []>} : vector<256x40xbf16>, vector<40x128xbf16>, vector<256x128xf32> -> vector<256x128xf32>
    %c0_3 = arith.constant 0 : index
    %c0_4 = arith.constant 0 : index
    %3 = vector.load %arg3[%c0_3, %c0_4] : memref<1x128xf32, #tpu.memory_space<vmem>>, vector<1x128xf32>
    %4 = vector.broadcast %3 : vector<1x128xf32> to vector<256x128xf32>
    %5 = arith.addf %2, %4 : vector<256x128xf32>
    %cst_5 = arith.constant 0.000000e+00 : f32
    %6 = vector.broadcast %cst_5 : f32 to vector<256x128xf32>
    %7 = arith.maximumf %5, %6 : vector<256x128xf32>
    %8 = arith.truncf %7 : vector<256x128xf32> to vector<256x128xbf16>
    %c0_6 = arith.constant 0 : index
    %c0_7 = arith.constant 0 : index
    %9 = vector.load %arg4[%c0_6, %c0_7] : memref<256x128xbf16, #tpu.memory_space<vmem>>, vector<256x128xbf16>
    tpu.vector_store %arg4[%c0_6, %c0_7], %8 {strides = array<i32>} : memref<256x128xbf16, #tpu.memory_space<vmem>>, vector<256x128xbf16>,
    return
  }
  func.func @transform_0(%arg0: i32) -> (i32, i32) {
    %c0_i32 = arith.constant 0 : i32
    %c0_i32_0 = arith.constant 0 : i32
    return %arg0, %c0_i32 : i32, i32
  }
  func.func @transform_1(%arg0: i32) -> (i32, i32) {
    %c0_i32 = arith.constant 0 : i32
    %c0_i32_0 = arith.constant 0 : i32
    %c0_i32_1 = arith.constant 0 : i32
    return %c0_i32, %c0_i32_0 : i32, i32
  }
  func.func @transform_2(%arg0: i32) -> (i32, i32) {
    %c0_i32 = arith.constant 0 : i32
    %c0_i32_0 = arith.constant 0 : i32
    %c0_i32_1 = arith.constant 0 : i32
    return %c0_i32, %c0_i32_0 : i32, i32
  }
  func.func @transform_3(%arg0: i32) -> (i32, i32) {
    %c0_i32 = arith.constant 0 : i32
    %c0_i32_0 = arith.constant 0 : i32
    return %arg0, %c0_i32 : i32, i32
  }
}

module attributes {stable_mosaic.version = 11 : i64} {
  func.func @_cbr_kernel(%arg0: i32, %arg1: memref<64x8xbf16, #tpu.memory_space<vmem>>, %arg2: memref<8x128xbf16, #tpu.memory_space<vmem>>, %arg3: memref<1x128xf32, #tpu.memory_space<vmem>>, %arg4: memref<64x128xbf16, #tpu.memory_space<vmem>>) attributes {dimension_semantics = [#tpu.dimension_semantics<parallel>], iteration_bounds = array<i64: 2>, scalar_prefetch = 0 : i64, scratch_operands = 0 : i64, tpu.core_type = #tpu.core_type<tc>, window_params = [{transform_indices = @transform_0, window_bounds = array<i64: 64, 8>}, {pipeline_mode = #tpu.pipeline_mode<synchronous>, transform_indices = @transform_1, window_bounds = array<i64: 8, 128>}, {pipeline_mode = #tpu.pipeline_mode<synchronous>, transform_indices = @transform_2, window_bounds = array<i64: 1, 128>}, {transform_indices = @transform_3, window_bounds = array<i64: 64, 128>}]} {
    %c0 = arith.constant 0 : index
    %c0_0 = arith.constant 0 : index
    %0 = vector.load %arg1[%c0, %c0_0] : memref<64x8xbf16, #tpu.memory_space<vmem>>, vector<64x8xbf16>
    %c0_1 = arith.constant 0 : index
    %c0_2 = arith.constant 0 : index
    %1 = vector.load %arg2[%c0_1, %c0_2] : memref<8x128xbf16, #tpu.memory_space<vmem>>, vector<8x128xbf16>
    %cst = arith.constant dense<0.000000e+00> : vector<64x128xf32>
    %2 = tpu.matmul %0, %1, %cst {dimension_numbers = #tpu.dot_dimension_numbers<[1], [0], [0], [1], [0, 0, 1, 1], [], []>} : vector<64x8xbf16>, vector<8x128xbf16>, vector<64x128xf32> -> vector<64x128xf32>
    %c0_3 = arith.constant 0 : index
    %c0_4 = arith.constant 0 : index
    %3 = vector.load %arg3[%c0_3, %c0_4] : memref<1x128xf32, #tpu.memory_space<vmem>>, vector<1x128xf32>
    %4 = vector.broadcast %3 : vector<1x128xf32> to vector<64x128xf32>
    %5 = arith.addf %2, %4 : vector<64x128xf32>
    %cst_5 = arith.constant 0.000000e+00 : f32
    %6 = vector.broadcast %cst_5 : f32 to vector<64x128xf32>
    %7 = arith.maximumf %5, %6 : vector<64x128xf32>
    %8 = arith.truncf %7 : vector<64x128xf32> to vector<64x128xbf16>
    %c0_6 = arith.constant 0 : index
    %c0_7 = arith.constant 0 : index
    %9 = vector.load %arg4[%c0_6, %c0_7] : memref<64x128xbf16, #tpu.memory_space<vmem>>, vector<64x128xbf16>
    tpu.vector_store %arg4[%c0_6, %c0_7], %8 {strides = array<i32>} : memref<64x128xbf16, #tpu.memory_space<vmem>>, vector<64x128xbf16>,
    return
  }
  func.func @transform_0(%arg0: i32) -> (i32, i32) {
    %c0_i32 = arith.constant 0 : i32
    %c0_i32_0 = arith.constant 0 : i32
    return %arg0, %c0_i32 : i32, i32
  }
  func.func @transform_1(%arg0: i32) -> (i32, i32) {
    %c0_i32 = arith.constant 0 : i32
    %c0_i32_0 = arith.constant 0 : i32
    %c0_i32_1 = arith.constant 0 : i32
    return %c0_i32, %c0_i32_0 : i32, i32
  }
  func.func @transform_2(%arg0: i32) -> (i32, i32) {
    %c0_i32 = arith.constant 0 : i32
    %c0_i32_0 = arith.constant 0 : i32
    %c0_i32_1 = arith.constant 0 : i32
    return %c0_i32, %c0_i32_0 : i32, i32
  }
  func.func @transform_3(%arg0: i32) -> (i32, i32) {
    %c0_i32 = arith.constant 0 : i32
    %c0_i32_0 = arith.constant 0 : i32
    return %arg0, %c0_i32 : i32, i32
  }
}

module attributes {stable_mosaic.version = 11 : i64} {
  func.func @_cbr_kernel(%arg0: i32, %arg1: memref<64x40xbf16, #tpu.memory_space<vmem>>, %arg2: memref<40x128xbf16, #tpu.memory_space<vmem>>, %arg3: memref<1x128xf32, #tpu.memory_space<vmem>>, %arg4: memref<64x128xbf16, #tpu.memory_space<vmem>>) attributes {dimension_semantics = [#tpu.dimension_semantics<parallel>], iteration_bounds = array<i64: 2>, scalar_prefetch = 0 : i64, scratch_operands = 0 : i64, tpu.core_type = #tpu.core_type<tc>, window_params = [{transform_indices = @transform_0, window_bounds = array<i64: 64, 40>}, {pipeline_mode = #tpu.pipeline_mode<synchronous>, transform_indices = @transform_1, window_bounds = array<i64: 40, 128>}, {pipeline_mode = #tpu.pipeline_mode<synchronous>, transform_indices = @transform_2, window_bounds = array<i64: 1, 128>}, {transform_indices = @transform_3, window_bounds = array<i64: 64, 128>}]} {
    %c0 = arith.constant 0 : index
    %c0_0 = arith.constant 0 : index
    %0 = vector.load %arg1[%c0, %c0_0] : memref<64x40xbf16, #tpu.memory_space<vmem>>, vector<64x40xbf16>
    %c0_1 = arith.constant 0 : index
    %c0_2 = arith.constant 0 : index
    %1 = vector.load %arg2[%c0_1, %c0_2] : memref<40x128xbf16, #tpu.memory_space<vmem>>, vector<40x128xbf16>
    %cst = arith.constant dense<0.000000e+00> : vector<64x128xf32>
    %2 = tpu.matmul %0, %1, %cst {dimension_numbers = #tpu.dot_dimension_numbers<[1], [0], [0], [1], [0, 0, 1, 1], [], []>} : vector<64x40xbf16>, vector<40x128xbf16>, vector<64x128xf32> -> vector<64x128xf32>
    %c0_3 = arith.constant 0 : index
    %c0_4 = arith.constant 0 : index
    %3 = vector.load %arg3[%c0_3, %c0_4] : memref<1x128xf32, #tpu.memory_space<vmem>>, vector<1x128xf32>
    %4 = vector.broadcast %3 : vector<1x128xf32> to vector<64x128xf32>
    %5 = arith.addf %2, %4 : vector<64x128xf32>
    %cst_5 = arith.constant 0.000000e+00 : f32
    %6 = vector.broadcast %cst_5 : f32 to vector<64x128xf32>
    %7 = arith.maximumf %5, %6 : vector<64x128xf32>
    %8 = arith.truncf %7 : vector<64x128xf32> to vector<64x128xbf16>
    %c0_6 = arith.constant 0 : index
    %c0_7 = arith.constant 0 : index
    %9 = vector.load %arg4[%c0_6, %c0_7] : memref<64x128xbf16, #tpu.memory_space<vmem>>, vector<64x128xbf16>
    tpu.vector_store %arg4[%c0_6, %c0_7], %8 {strides = array<i32>} : memref<64x128xbf16, #tpu.memory_space<vmem>>, vector<64x128xbf16>,
    return
  }
  func.func @transform_0(%arg0: i32) -> (i32, i32) {
    %c0_i32 = arith.constant 0 : i32
    %c0_i32_0 = arith.constant 0 : i32
    return %arg0, %c0_i32 : i32, i32
  }
  func.func @transform_1(%arg0: i32) -> (i32, i32) {
    %c0_i32 = arith.constant 0 : i32
    %c0_i32_0 = arith.constant 0 : i32
    %c0_i32_1 = arith.constant 0 : i32
    return %c0_i32, %c0_i32_0 : i32, i32
  }
  func.func @transform_2(%arg0: i32) -> (i32, i32) {
    %c0_i32 = arith.constant 0 : i32
    %c0_i32_0 = arith.constant 0 : i32
    %c0_i32_1 = arith.constant 0 : i32
    return %c0_i32, %c0_i32_0 : i32, i32
  }
  func.func @transform_3(%arg0: i32) -> (i32, i32) {
    %c0_i32 = arith.constant 0 : i32
    %c0_i32_0 = arith.constant 0 : i32
    return %arg0, %c0_i32 : i32, i32
  }
}

module attributes {stable_mosaic.version = 11 : i64} {
  func.func @_cbr_residual_kernel(%arg0: i32, %arg1: memref<64x40xbf16, #tpu.memory_space<vmem>>, %arg2: memref<40x128xbf16, #tpu.memory_space<vmem>>, %arg3: memref<1x128xf32, #tpu.memory_space<vmem>>, %arg4: memref<64x128xbf16, #tpu.memory_space<vmem>>, %arg5: memref<64x128xbf16, #tpu.memory_space<vmem>>) attributes {dimension_semantics = [#tpu.dimension_semantics<parallel>], iteration_bounds = array<i64: 2>, scalar_prefetch = 0 : i64, scratch_operands = 0 : i64, tpu.core_type = #tpu.core_type<tc>, window_params = [{transform_indices = @transform_0, window_bounds = array<i64: 64, 40>}, {pipeline_mode = #tpu.pipeline_mode<synchronous>, transform_indices = @transform_1, window_bounds = array<i64: 40, 128>}, {pipeline_mode = #tpu.pipeline_mode<synchronous>, transform_indices = @transform_2, window_bounds = array<i64: 1, 128>}, {transform_indices = @transform_3, window_bounds = array<i64: 64, 128>}, {transform_indices = @transform_4, window_bounds = array<i64: 64, 128>}]} {
    %c0 = arith.constant 0 : index
    %c0_0 = arith.constant 0 : index
    %0 = vector.load %arg1[%c0, %c0_0] : memref<64x40xbf16, #tpu.memory_space<vmem>>, vector<64x40xbf16>
    %c0_1 = arith.constant 0 : index
    %c0_2 = arith.constant 0 : index
    %1 = vector.load %arg2[%c0_1, %c0_2] : memref<40x128xbf16, #tpu.memory_space<vmem>>, vector<40x128xbf16>
    %cst = arith.constant dense<0.000000e+00> : vector<64x128xf32>
    %2 = tpu.matmul %0, %1, %cst {dimension_numbers = #tpu.dot_dimension_numbers<[1], [0], [0], [1], [0, 0, 1, 1], [], []>} : vector<64x40xbf16>, vector<40x128xbf16>, vector<64x128xf32> -> vector<64x128xf32>
    %c0_3 = arith.constant 0 : index
    %c0_4 = arith.constant 0 : index
    %3 = vector.load %arg3[%c0_3, %c0_4] : memref<1x128xf32, #tpu.memory_space<vmem>>, vector<1x128xf32>
    %4 = vector.broadcast %3 : vector<1x128xf32> to vector<64x128xf32>
    %5 = arith.addf %2, %4 : vector<64x128xf32>
    %cst_5 = arith.constant 0.000000e+00 : f32
    %6 = vector.broadcast %cst_5 : f32 to vector<64x128xf32>
    %7 = arith.maximumf %5, %6 : vector<64x128xf32>
    %c0_6 = arith.constant 0 : index
    %c0_7 = arith.constant 0 : index
    %8 = vector.load %arg4[%c0_6, %c0_7] : memref<64x128xbf16, #tpu.memory_space<vmem>>, vector<64x128xbf16>
    %9 = arith.extf %8 : vector<64x128xbf16> to vector<64x128xf32>
    %10 = arith.addf %7, %9 : vector<64x128xf32>
    %11 = arith.truncf %10 : vector<64x128xf32> to vector<64x128xbf16>
    %c0_8 = arith.constant 0 : index
    %c0_9 = arith.constant 0 : index
    %12 = vector.load %arg5[%c0_8, %c0_9] : memref<64x128xbf16, #tpu.memory_space<vmem>>, vector<64x128xbf16>
    tpu.vector_store %arg5[%c0_8, %c0_9], %11 {strides = array<i32>} : memref<64x128xbf16, #tpu.memory_space<vmem>>, vector<64x128xbf16>,
    return
  }
  func.func @transform_0(%arg0: i32) -> (i32, i32) {
    %c0_i32 = arith.constant 0 : i32
    %c0_i32_0 = arith.constant 0 : i32
    return %arg0, %c0_i32 : i32, i32
  }
  func.func @transform_1(%arg0: i32) -> (i32, i32) {
    %c0_i32 = arith.constant 0 : i32
    %c0_i32_0 = arith.constant 0 : i32
    %c0_i32_1 = arith.constant 0 : i32
    return %c0_i32, %c0_i32_0 : i32, i32
  }
  func.func @transform_2(%arg0: i32) -> (i32, i32) {
    %c0_i32 = arith.constant 0 : i32
    %c0_i32_0 = arith.constant 0 : i32
    %c0_i32_1 = arith.constant 0 : i32
    return %c0_i32, %c0_i32_0 : i32, i32
  }
  func.func @transform_3(%arg0: i32) -> (i32, i32) {
    %c0_i32 = arith.constant 0 : i32
    %c0_i32_0 = arith.constant 0 : i32
    return %arg0, %c0_i32 : i32, i32
  }
  func.func @transform_4(%arg0: i32) -> (i32, i32) {
    %c0_i32 = arith.constant 0 : i32
    %c0_i32_0 = arith.constant 0 : i32
    return %arg0, %c0_i32 : i32, i32
  }
}

module attributes {stable_mosaic.version = 11 : i64} {
  func.func @_cbr_concat2_kernel(%arg0: i32, %arg1: memref<64x8xbf16, #tpu.memory_space<vmem>>, %arg2: memref<64x8xbf16, #tpu.memory_space<vmem>>, %arg3: memref<8x128xbf16, #tpu.memory_space<vmem>>, %arg4: memref<8x128xbf16, #tpu.memory_space<vmem>>, %arg5: memref<1x128xf32, #tpu.memory_space<vmem>>, %arg6: memref<64x128xf32, #tpu.memory_space<vmem>>) attributes {dimension_semantics = [#tpu.dimension_semantics<parallel>], iteration_bounds = array<i64: 2>, scalar_prefetch = 0 : i64, scratch_operands = 0 : i64, tpu.core_type = #tpu.core_type<tc>, window_params = [{transform_indices = @transform_0, window_bounds = array<i64: 64, 8>}, {transform_indices = @transform_1, window_bounds = array<i64: 64, 8>}, {pipeline_mode = #tpu.pipeline_mode<synchronous>, transform_indices = @transform_2, window_bounds = array<i64: 8, 128>}, {pipeline_mode = #tpu.pipeline_mode<synchronous>, transform_indices = @transform_3, window_bounds = array<i64: 8, 128>}, {pipeline_mode = #tpu.pipeline_mode<synchronous>, transform_indices = @transform_4, window_bounds = array<i64: 1, 128>}, {transform_indices = @transform_5, window_bounds = array<i64: 64, 128>}]} {
    %c0 = arith.constant 0 : index
    %c0_0 = arith.constant 0 : index
    %0 = vector.load %arg1[%c0, %c0_0] : memref<64x8xbf16, #tpu.memory_space<vmem>>, vector<64x8xbf16>
    %c0_1 = arith.constant 0 : index
    %c0_2 = arith.constant 0 : index
    %1 = vector.load %arg3[%c0_1, %c0_2] : memref<8x128xbf16, #tpu.memory_space<vmem>>, vector<8x128xbf16>
    %cst = arith.constant dense<0.000000e+00> : vector<64x128xf32>
    %2 = tpu.matmul %0, %1, %cst {dimension_numbers = #tpu.dot_dimension_numbers<[1], [0], [0], [1], [0, 0, 1, 1], [], []>} : vector<64x8xbf16>, vector<8x128xbf16>, vector<64x128xf32> -> vector<64x128xf32>
    %c0_3 = arith.constant 0 : index
    %c0_4 = arith.constant 0 : index
    %3 = vector.load %arg2[%c0_3, %c0_4] : memref<64x8xbf16, #tpu.memory_space<vmem>>, vector<64x8xbf16>
    %c0_5 = arith.constant 0 : index
    %c0_6 = arith.constant 0 : index
    %4 = vector.load %arg4[%c0_5, %c0_6] : memref<8x128xbf16, #tpu.memory_space<vmem>>, vector<8x128xbf16>
    %cst_7 = arith.constant dense<0.000000e+00> : vector<64x128xf32>
    %5 = tpu.matmul %3, %4, %cst_7 {dimension_numbers = #tpu.dot_dimension_numbers<[1], [0], [0], [1], [0, 0, 1, 1], [], []>} : vector<64x8xbf16>, vector<8x128xbf16>, vector<64x128xf32> -> vector<64x128xf32>
    %6 = arith.addf %2, %5 : vector<64x128xf32>
    %c0_8 = arith.constant 0 : index
    %c0_9 = arith.constant 0 : index
    %7 = vector.load %arg5[%c0_8, %c0_9] : memref<1x128xf32, #tpu.memory_space<vmem>>, vector<1x128xf32>
    %8 = vector.broadcast %7 : vector<1x128xf32> to vector<64x128xf32>
    %9 = arith.addf %6, %8 : vector<64x128xf32>
    %cst_10 = arith.constant 0.000000e+00 : f32
    %10 = vector.broadcast %cst_10 : f32 to vector<64x128xf32>
    %11 = arith.maximumf %9, %10 : vector<64x128xf32>
    %c0_11 = arith.constant 0 : index
    %c0_12 = arith.constant 0 : index
    %12 = vector.load %arg6[%c0_11, %c0_12] : memref<64x128xf32, #tpu.memory_space<vmem>>, vector<64x128xf32>
    tpu.vector_store %arg6[%c0_11, %c0_12], %11 {strides = array<i32>} : memref<64x128xf32, #tpu.memory_space<vmem>>, vector<64x128xf32>,
    return
  }
  func.func @transform_0(%arg0: i32) -> (i32, i32) {
    %c0_i32 = arith.constant 0 : i32
    %c0_i32_0 = arith.constant 0 : i32
    return %arg0, %c0_i32 : i32, i32
  }
  func.func @transform_1(%arg0: i32) -> (i32, i32) {
    %c0_i32 = arith.constant 0 : i32
    %c0_i32_0 = arith.constant 0 : i32
    return %arg0, %c0_i32 : i32, i32
  }
  func.func @transform_2(%arg0: i32) -> (i32, i32) {
    %c0_i32 = arith.constant 0 : i32
    %c0_i32_0 = arith.constant 0 : i32
    %c0_i32_1 = arith.constant 0 : i32
    return %c0_i32, %c0_i32_0 : i32, i32
  }
  func.func @transform_3(%arg0: i32) -> (i32, i32) {
    %c0_i32 = arith.constant 0 : i32
    %c0_i32_0 = arith.constant 0 : i32
    %c0_i32_1 = arith.constant 0 : i32
    return %c0_i32, %c0_i32_0 : i32, i32
  }
  func.func @transform_4(%arg0: i32) -> (i32, i32) {
    %c0_i32 = arith.constant 0 : i32
    %c0_i32_0 = arith.constant 0 : i32
    %c0_i32_1 = arith.constant 0 : i32
    return %c0_i32, %c0_i32_0 : i32, i32
  }
  func.func @transform_5(%arg0: i32) -> (i32, i32) {
    %c0_i32 = arith.constant 0 : i32
    %c0_i32_0 = arith.constant 0 : i32
    return %arg0, %c0_i32 : i32, i32
  }
}

</mosaic_0001>

<bundles_post_ra>
// kernel: _lambda_.8
= control target key start
LH: loop header
LB: loop body
LE: loop exit
PB: predicated region body
PF: predicated region fallthrough
CT: control target
= control target key end

     0   :  { %s1102_s12 = smov 0   ;;  %s1224_s0 = inlined_call_operand.vmem [shape: bf16[512,40], index: 0, kind: input, shape index: {}]   ;;  %s1225_s1 = inlined_call_operand.vmem [shape: bf16[40,128], index: 1, kind: input, shape index: {}]   ;;  %s1226_s2 = inlined_call_operand.vmem [shape: f32[1,128], index: 2, kind: input, shape index: {}]   ;;  %s1227_s3 = inlined_call_operand.vmem [shape: bf16[512,128], index: 3, kind: output, shape index: {}]  }
   0x1 LB: > { %s776_s13 = sadd.s32 4294967295, %s1080_s12   ;;  %p780_p0 = scmp.ge.s32.totalorder %s1080_s12, 1  ;;  %s1080_s12 = sphi %s1102_s12, %s13_s12  }
   0x2   : > { %p138_p1 = scmp.lt.s32.totalorder %s1080_s12, 3 }
   0x4   : > { %p139_p2 = pnand %p780_p0, %p138_p1 }
   0x5   : > { %v1055_v0 = vld [vmem:[%s1225_s1] sm:$0xff] (!%p139_p2)   ;;  %v1056_v1 = vld [vmem:[%s1225_s1 + $0x8] sm:$0xff] (!%p139_p2)   ;;  %s781_s18 = sshll.u32 (!%p139_p2), %s776_s13, 5  ;;  %v1057_v2 = vld [vmem:[%s1225_s1 + $0x10] ss:$0 sps:$4 sm:$0xff] (!%p139_p2)   ;;  %vm363_vm0 = vcmask (!%p139_p2), 1043456  }
   0x6   : > { %142 = sbr.rel (%p139_p2) target bundleno = 265 (0x109), region = 32  ;;  %1001 = vmatprep.subr.bf16.mxu0 (!%p139_p2), %v1055_v0  ;;  %1039 = vmatprep.subr.bf16.mxu1 (!%p139_p2), %v1055_v0  ;;  %p163_p3 = scmp.lt.s32.totalorder (!%p139_p2), %s781_s18, 63  ;;  %vm314_vm1 = vcmask (!%p139_p2), 326656   ;;  %v365_v3 = vsel (!%p139_p2), %vm363_vm0, %v1057_v2, 0  ;;  %v1164_v20 = vld [vmem:[%s1226_s2] ss:$0 sm:$0xff] (!%p139_p2) }
   0x7   : > { %1002 = vmatpush3.bf16.msra.mxu0 (!%p139_p2), %v1055_v0  ;;  %1042 = vmatpush3.bf16.msra.mxu1 (!%p139_p2), %v1055_v0 }
   0x8   : > { %1003 = vmatprep.subr.bf16.mxu0 (!%p139_p2), %v1056_v1  ;;  %1040 = vmatprep.subr.bf16.mxu1 (!%p139_p2), %v1056_v1 }
   0xb   : > { %1004 = vmatpush3.bf16.msra.mxu0 (!%p139_p2), %v1056_v1  ;;  %1043 = vmatpush3.bf16.msra.mxu1 (!%p139_p2), %v1056_v1 }
   0xc   : > { %1045 = vmatprep.subr.msk.bf16.mxu0 (!%p139_p2), %vm363_vm0, %v1057_v2  ;;  %1046 = vmatprep.subr.msk.bf16.mxu1 (!%p139_p2), %vm363_vm0, %v1057_v2 }
   0xd   : > { %s1229_s18 = smov (!%p163_p3, %s781_s18), 63 }
   0xe   : > { %s782_s21 = sshll.u32 %s1229_s18, 2 }
   0xf   : > { %s1127_s24 = scalar_lea.vmem %s1224_s0, %s782_s21  ;;  %1006 = vmatpush3.bf16.msra.mxu0 %v365_v3  ;;  %1044 = vmatpush3.bf16.msra.mxu1 %v365_v3  ;;  %s1179_s29 = scalar_lea.vmem %s1227_s3, %s782_s21 }
  0x10   : > { %v1058_v4 = vld [vmem:[%s1127_s24] sm:$0xff]   ;;  %v1060_v6 = vld [vmem:[%s1127_s24 + $0x8] sm:$0xff]   ;;  %v1062_v8 = vld [vmem:[%s1127_s24 + $0x10] sm:$0xff]  }
  0x11   : > { %v1059_v5 = vld [vmem:[%s1127_s24 + $0x40] sm:$0xff]   ;;  %1007 = vmatprep.mubr.msk.bf16.mxu0 %vm314_vm1, %v1058_v4  ;;  %v1061_v7 = vld [vmem:[%s1127_s24 + $0x48] sm:$0xff]   ;;  %v1063_v9 = vld [vmem:[%s1127_s24 + $0x50] sm:$0xff]  }
  0x12   : > { %1023 = vmatprep.mubr.msk.bf16.mxu1 %vm314_vm1, %v1059_v5  ;;  %1008 = vmatmul.mubr.msk.bf16.vlgmr.msra.gmra.mrb[0].mxu0 %vm314_vm1, %v1060_v6  ;;  %v1064_v10 = vld [vmem:[%s1127_s24 + $0x18] sm:$0xff]   ;;  %v1066_v12 = vld [vmem:[%s1127_s24 + $0x20] sm:$0xff]   ;;  %v1068_v14 = vld [vmem:[%s1127_s24 + $0x28] sm:$0xff]  }
  0x13   : > { %1024 = vmatmul.mubr.msk.bf16.vlgmr.msra.gmra.mrb[0].mxu1 %vm314_vm1, %v1061_v7  ;;  %1011 = vmatprep.mubr.msk.bf16.mxu0 %vm314_vm1, %v1062_v8  ;;  %v1065_v11 = vld [vmem:[%s1127_s24 + $0x58] sm:$0xff]   ;;  %v1067_v13 = vld [vmem:[%s1127_s24 + $0x60] sm:$0xff]   ;;  %v1069_v15 = vld [vmem:[%s1127_s24 + $0x68] sm:$0xff]  }
  0x14   : > { %1027 = vmatprep.mubr.msk.bf16.mxu1 %vm314_vm1, %v1063_v9  ;;  %v1070_v16 = vld [vmem:[%s1127_s24 + $0x30] sm:$0xff]   ;;  %v1072_v18 = vld [vmem:[%s1127_s24 + $0x38] sm:$0xff]  }
  0x15   : > { %v1071_v17 = vld [vmem:[%s1127_s24 + $0x70] sm:$0xff]   ;;  %v1073_v19 = vld [vmem:[%s1127_s24 + $0x78] sm:$0xff]  }
  0x1a   : > { %1012 = vmatmul.mubr.msk.bf16.gmra.mrb[4].mxu0 %vm314_vm1, %v1064_v10 }
  0x1b   : > { %1028 = vmatmul.mubr.msk.bf16.gmra.mrb[4].mxu1 %vm314_vm1, %v1065_v11  ;;  %1015 = vmatprep.mubr.msk.bf16.mxu0 %vm314_vm1, %v1066_v12 }
  0x1c   : > { %1031 = vmatprep.mubr.msk.bf16.mxu1 %vm314_vm1, %v1067_v13 }
  0x22   : > { %1016 = vmatmul.mubr.msk.bf16.gmra.mrb[8].mxu0 %vm314_vm1, %v1068_v14 }
  0x23   : > { %1032 = vmatmul.mubr.msk.bf16.gmra.mrb[8].mxu1 %vm314_vm1, %v1069_v15  ;;  %1019 = vmatprep.mubr.msk.bf16.mxu0 %vm314_vm1, %v1070_v16 }
  0x24   : > { %1035 = vmatprep.mubr.msk.bf16.mxu1 %vm314_vm1, %v1071_v17 }
  0x2a   : > { %1020 = vmatmul.mubr.msk.bf16.gmra.mrb[12].mxu0 %vm314_vm1, %v1072_v18 }
  0x2b   : > { %1036 = vmatmul.mubr.msk.bf16.gmra.mrb[12].mxu1 %vm314_vm1, %v1073_v19 }
  0xe5   : > { %v1009_v21 = vpop.f32.mrb[0].mxu0 }
  0xe6   : > { %v1025_v22 = vpop.f32.mrb[0].mxu1  ;;  %v410_v23 = vadd.f32 %v1009_v21, %v1164_v20  ;;  %v401_v25 = vpop.f32.mrb[1].mxu0 }
  0xe7   : > { %v474_v24 = vadd.f32 %v1025_v22, %v1164_v20  ;;  %v465_v26 = vpop.f32.mrb[1].mxu1  ;;  %v402_v27 = vadd.f32 %v1164_v20, %v401_v25  ;;  %v1010_v29 = vpop.f32.mrb[2].mxu0 }
  0xe8   : > { %v466_v28 = vadd.f32 %v1164_v20, %v465_v26  ;;  %v1026_v30 = vpop.f32.mrb[2].mxu1  ;;  %v413_v31 = vadd.f32 %v1010_v29, %v1164_v20  ;;  %v404_v33 = vpop.f32.mrb[3].mxu0  ;;  %v530_v37 = vmax.f32 %v410_v23, 0.0 }
  0xe9   : > { %v477_v32 = vadd.f32 %v1026_v30, %v1164_v20  ;;  %v468_v34 = vpop.f32.mrb[3].mxu1  ;;  %v405_v35 = vadd.f32 %v1164_v20, %v404_v33  ;;  %v546_v38 = vmax.f32 %v474_v24, 0.0  ;;  %v528_v41 = vmax.f32 %v402_v27, 0.0 }
  0xea   : > { %v469_v36 = vadd.f32 %v1164_v20, %v468_v34  ;;  %v531_v39 = vmax.f32 %v413_v31, 0.0  ;;  %v544_v42 = vmax.f32 %v466_v28, 0.0 }
  0xeb   : > { %v547_v40 = vmax.f32 %v477_v32, 0.0  ;;  %v529_v43 = vmax.f32 %v405_v35, 0.0 }
  0xec   : > { %v545_v44 = vmax.f32 %v469_v36, 0.0  ;;  %v895_v45 = vpack.c.bf16 %v531_v39, %v530_v37 }
  0xed   : > { %v935_v46 = vpack.c.bf16 %v547_v40, %v546_v38  ;;  %v890_v47 = vpack.c.bf16 %v529_v43, %v528_v41  ;;  %v1013_v49 = vpop.f32.mrb[4].mxu0 }
  0xee   : > { %v930_v48 = vpack.c.bf16 %v545_v44, %v544_v42  ;;  %v1029_v50 = vpop.f32.mrb[4].mxu1  ;;  %967 = vst [vmem:[%s1179_s29 + $0x8] sm:$0xff] %v895_v45   ;;  %v426_v51 = vadd.f32 %v1013_v49, %v1164_v20  ;;  %v417_v53 = vpop.f32.mrb[5].mxu0 }
  0xef   : > { %975 = vst [vmem:[%s1179_s29 + $0x48] sm:$0xff] %v935_v46   ;;  %v490_v52 = vadd.f32 %v1029_v50, %v1164_v20  ;;  %v481_v54 = vpop.f32.mrb[5].mxu1  ;;  %891 = vst [vmem:[%s1179_s29] sm:$0xff] %v890_v47   ;;  %v418_v55 = vadd.f32 %v1164_v20, %v417_v53  ;;  %v1014_v57 = vpop.f32.mrb[6].mxu0 }
  0xf0   : > { %974 = vst [vmem:[%s1179_s29 + $0x40] sm:$0xff] %v930_v48   ;;  %v482_v56 = vadd.f32 %v1164_v20, %v481_v54  ;;  %v1030_v58 = vpop.f32.mrb[6].mxu1  ;;  %v429_v59 = vadd.f32 %v1014_v57, %v1164_v20  ;;  %v420_v61 = vpop.f32.mrb[7].mxu0  ;;  %v534_v1 = vmax.f32 %v426_v51, 0.0 }
  0xf1   : > { %v493_v60 = vadd.f32 %v1030_v58, %v1164_v20  ;;  %v484_v62 = vpop.f32.mrb[7].mxu1  ;;  %v421_v63 = vadd.f32 %v1164_v20, %v420_v61  ;;  %v550_v2 = vmax.f32 %v490_v52, 0.0  ;;  %v532_v5 = vmax.f32 %v418_v55, 0.0 }
  0xf2   : > { %v485_v0 = vadd.f32 %v1164_v20, %v484_v62  ;;  %v535_v3 = vmax.f32 %v429_v59, 0.0  ;;  %v548_v6 = vmax.f32 %v482_v56, 0.0 }
  0xf3   : > { %v551_v4 = vmax.f32 %v493_v60, 0.0  ;;  %v533_v7 = vmax.f32 %v421_v63, 0.0 }
  0xf4   : > { %v549_v8 = vmax.f32 %v485_v0, 0.0  ;;  %v905_v9 = vpack.c.bf16 %v535_v3, %v534_v1 }
  0xf5   : > { %v945_v10 = vpack.c.bf16 %v551_v4, %v550_v2  ;;  %v900_v11 = vpack.c.bf16 %v533_v7, %v532_v5  ;;  %v1017_v13 = vpop.f32.mrb[8].mxu0 }
  0xf6   : > { %v940_v12 = vpack.c.bf16 %v549_v8, %v548_v6  ;;  %v1033_v14 = vpop.f32.mrb[8].mxu1  ;;  %969 = vst [vmem:[%s1179_s29 + $0x18] sm:$0xff] %v905_v9   ;;  %v442_v15 = vadd.f32 %v1017_v13, %v1164_v20  ;;  %v433_v17 = vpop.f32.mrb[9].mxu0 }
  0xf7   : > { %977 = vst [vmem:[%s1179_s29 + $0x58] sm:$0xff] %v945_v10   ;;  %v506_v16 = vadd.f32 %v1033_v14, %v1164_v20  ;;  %v497_v18 = vpop.f32.mrb[9].mxu1  ;;  %968 = vst [vmem:[%s1179_s29 + $0x10] sm:$0xff] %v900_v11   ;;  %v434_v19 = vadd.f32 %v1164_v20, %v433_v17  ;;  %v1018_v22 = vpop.f32.mrb[10].mxu0 }
  0xf8   : > { %976 = vst [vmem:[%s1179_s29 + $0x50] sm:$0xff] %v940_v12   ;;  %v498_v21 = vadd.f32 %v1164_v20, %v497_v18  ;;  %v1034_v23 = vpop.f32.mrb[10].mxu1  ;;  %v445_v24 = vadd.f32 %v1018_v22, %v1164_v20  ;;  %v436_v26 = vpop.f32.mrb[11].mxu0  ;;  %v538_v30 = vmax.f32 %v442_v15, 0.0 }
  0xf9   : > { %v509_v25 = vadd.f32 %v1034_v23, %v1164_v20  ;;  %v500_v27 = vpop.f32.mrb[11].mxu1  ;;  %v437_v28 = vadd.f32 %v1164_v20, %v436_v26  ;;  %v554_v31 = vmax.f32 %v506_v16, 0.0  ;;  %v536_v34 = vmax.f32 %v434_v19, 0.0 }
  0xfa   : > { %v501_v29 = vadd.f32 %v1164_v20, %v500_v27  ;;  %v539_v32 = vmax.f32 %v445_v24, 0.0  ;;  %v552_v35 = vmax.f32 %v498_v21, 0.0 }
  0xfb   : > { %v555_v33 = vmax.f32 %v509_v25, 0.0  ;;  %v537_v36 = vmax.f32 %v437_v28, 0.0 }
  0xfc   : > { %v553_v37 = vmax.f32 %v501_v29, 0.0  ;;  %v915_v38 = vpack.c.bf16 %v539_v32, %v538_v30 }
  0xfd   : > { %v955_v39 = vpack.c.bf16 %v555_v33, %v554_v31  ;;  %v910_v40 = vpack.c.bf16 %v537_v36, %v536_v34  ;;  %v1021_v42 = vpop.f32.mrb[12].mxu0 }
  0xfe   : > { %v950_v41 = vpack.c.bf16 %v553_v37, %v552_v35  ;;  %v1037_v43 = vpop.f32.mrb[12].mxu1  ;;  %971 = vst [vmem:[%s1179_s29 + $0x28] sm:$0xff] %v915_v38   ;;  %v458_v44 = vadd.f32 %v1021_v42, %v1164_v20  ;;  %v449_v46 = vpop.f32.mrb[13].mxu0 }
  0xff   : > { %979 = vst [vmem:[%s1179_s29 + $0x68] sm:$0xff] %v955_v39   ;;  %v522_v45 = vadd.f32 %v1037_v43, %v1164_v20  ;;  %v513_v47 = vpop.f32.mrb[13].mxu1  ;;  %970 = vst [vmem:[%s1179_s29 + $0x20] sm:$0xff] %v910_v40   ;;  %v450_v48 = vadd.f32 %v1164_v20, %v449_v46  ;;  %v1022_v50 = vpop.f32.mrb[14].mxu0 }
 0x100   : > { %978 = vst [vmem:[%s1179_s29 + $0x60] sm:$0xff] %v950_v41   ;;  %v514_v49 = vadd.f32 %v1164_v20, %v513_v47  ;;  %v1038_v51 = vpop.f32.mrb[14].mxu1  ;;  %v461_v52 = vadd.f32 %v1022_v50, %v1164_v20  ;;  %v452_v54 = vpop.f32.mrb[15].mxu0  ;;  %v542_v58 = vmax.f32 %v458_v44, 0.0 }
 0x101   : > { %v525_v53 = vadd.f32 %v1038_v51, %v1164_v20  ;;  %v516_v55 = vpop.f32.mrb[15].mxu1  ;;  %v453_v56 = vadd.f32 %v1164_v20, %v452_v54  ;;  %v558_v59 = vmax.f32 %v522_v45, 0.0  ;;  %v540_v62 = vmax.f32 %v450_v48, 0.0 }
 0x102   : > { %v517_v57 = vadd.f32 %v1164_v20, %v516_v55  ;;  %v543_v60 = vmax.f32 %v461_v52, 0.0  ;;  %v556_v63 = vmax.f32 %v514_v49, 0.0 }
 0x103   : > { %v559_v61 = vmax.f32 %v525_v53, 0.0  ;;  %v541_v0 = vmax.f32 %v453_v56, 0.0 }
 0x104   : > { %v557_v1 = vmax.f32 %v517_v57, 0.0  ;;  %v925_v2 = vpack.c.bf16 %v543_v60, %v542_v58 }
 0x105   : > { %v965_v3 = vpack.c.bf16 %v559_v61, %v558_v59  ;;  %v920_v4 = vpack.c.bf16 %v541_v0, %v540_v62 }
 0x106   : > { %v960_v5 = vpack.c.bf16 %v557_v1, %v556_v63  ;;  %973 = vst [vmem:[%s1179_s29 + $0x38] sm:$0xff] %v925_v2  }
 0x107   : > { %981 = vst [vmem:[%s1179_s29 + $0x78] sm:$0xff] %v965_v3   ;;  %972 = vst [vmem:[%s1179_s29 + $0x30] sm:$0xff] %v920_v4  }
 0x108   : > { %980 = vst [vmem:[%s1179_s29 + $0x70] sm:$0xff] %v960_v5  }
 0x109 PF: > { %s13_s12 = sadd.s32 1, %s1080_s12  }
 0x10a   : > { %p10_p4 = scmp.ge.s32.totalorder %s13_s12, 4  }
 0x10c   :  { %12 = sbr.rel (!%p10_p4) target bundleno = 1 (0x1), region = 62 }

// kernel: _lambda_.10
= control target key start
LH: loop header
LB: loop body
LE: loop exit
PB: predicated region body
PF: predicated region fallthrough
CT: control target
= control target key end

     0   :  { %s515_s12 = smov 0   ;;  %s545_s0 = inlined_call_operand.vmem [shape: bf16[128,8], index: 0, kind: input, shape index: {}]   ;;  %s546_s1 = inlined_call_operand.vmem [shape: bf16[8,128], index: 1, kind: input, shape index: {}]   ;;  %s547_s2 = inlined_call_operand.vmem [shape: f32[1,128], index: 2, kind: input, shape index: {}]   ;;  %s548_s3 = inlined_call_operand.vmem [shape: bf16[128,128], index: 3, kind: output, shape index: {}]  }
   0x1 LB: > { %s397_s13 = sadd.s32 4294967295, %s493_s12   ;;  %p401_p0 = scmp.ge.s32.totalorder %s493_s12, 1  ;;  %s493_s12 = sphi %s515_s12, %s13_s12  }
   0x2   : > { %p138_p1 = scmp.lt.s32.totalorder %s493_s12, 3 }
   0x4   : > { %p139_p2 = pnand %p401_p0, %p138_p1 }
   0x5   : > { %v183_v0 = vld [vmem:[%s546_s1] sm:$0xf] (!%p139_p2)  ;;  %vm224_vm0 = vcmask (!%p139_p2), 1043456   ;;  %s402_s16 = sshll.u32 (!%p139_p2), %s397_s13, 3  ;;  %vm211_vm1 = vcmask (!%p139_p2), 64512  }
   0x6   : > { %142 = sbr.rel (%p139_p2) target bundleno = 240 (0xf0), region = 32  ;;  %473 = vmatprep.subr.msk.bf16.mxu0 (!%p139_p2), %vm224_vm0, %v183_v0  ;;  %474 = vmatprep.subr.msk.bf16.mxu1 (!%p139_p2), %vm224_vm0, %v183_v0  ;;  %v226_v1 = vsel (!%p139_p2), %vm224_vm0, %v183_v0, 0  ;;  %p163_p3 = scmp.lt.s32.totalorder (!%p139_p2), %s402_s16, 15  ;;  %v406_v6 = vld [vmem:[%s547_s2] ss:$0 sm:$0xff] (!%p139_p2) }
   0x7   : > { %462 = vmatpush3.bf16.msra.mxu0 (!%p139_p2), %v226_v1  ;;  %472 = vmatpush3.bf16.msra.mxu1 (!%p139_p2), %v226_v1 }
   0xd   : > { %s550_s16 = smov (!%p163_p3, %s402_s16), 15 }
   0xe   : > { %s403_s17 = sshll.u32 %s550_s16, 2 }
   0xf   : > { %s166_s20 = scalar_lea.vmem %s545_s0, %s403_s17  ;;  %s172_s25 = scalar_lea.vmem %s548_s3, %s403_s17 }
  0x10   : > { %v483_v2 = vld [vmem:[%s166_s20] sm:$0xff]   ;;  %v484_v3 = vld [vmem:[%s166_s20 + $0x10] sm:$0xff]   ;;  %v485_v4 = vld [vmem:[%s166_s20 + $0x8] sm:$0xff]  }
  0x11   : > { %463 = vmatprep.mubr.msk.bf16.mxu0 %vm211_vm1, %v483_v2  ;;  %467 = vmatprep.mubr.msk.bf16.mxu1 %vm211_vm1, %v484_v3  ;;  %v486_v5 = vld [vmem:[%s166_s20 + $0x18] sm:$0xff]  }
  0x12   : > { %464 = vmatmul.mubr.msk.bf16.vlgmr.msra.gmra.mrb[0].mxu0 %vm211_vm1, %v485_v4  ;;  %468 = vmatmul.mubr.msk.bf16.vlgmr.msra.gmra.mrb[0].mxu1 %vm211_vm1, %v486_v5 }
  0xe5   : > { %v465_v7 = vpop.f32.mrb[0].mxu0  ;;  %v469_v9 = vpop.f32.mrb[0].mxu1 }
  0xe6   : > { %v271_v8 = vadd.f32 %v465_v7, %v406_v6  ;;  %v262_v10 = vpop.f32.mrb[1].mxu0  ;;  %v287_v11 = vadd.f32 %v469_v9, %v406_v6  ;;  %v278_v13 = vpop.f32.mrb[1].mxu1 }
  0xe7   : > { %v263_v12 = vadd.f32 %v406_v6, %v262_v10  ;;  %v466_v14 = vpop.f32.mrb[2].mxu0  ;;  %v279_v15 = vadd.f32 %v406_v6, %v278_v13  ;;  %v470_v17 = vpop.f32.mrb[2].mxu1 }
  0xe8   : > { %v274_v16 = vadd.f32 %v466_v14, %v406_v6  ;;  %v265_v18 = vpop.f32.mrb[3].mxu0  ;;  %v290_v19 = vadd.f32 %v470_v17, %v406_v6  ;;  %v281_v21 = vpop.f32.mrb[3].mxu1  ;;  %v295_v22 = vmax.f32 %v271_v8, 0.0  ;;  %v299_v25 = vmax.f32 %v287_v11, 0.0 }
  0xe9   : > { %v266_v20 = vadd.f32 %v406_v6, %v265_v18  ;;  %v282_v24 = vadd.f32 %v406_v6, %v281_v21  ;;  %v293_v26 = vmax.f32 %v263_v12, 0.0  ;;  %v297_v29 = vmax.f32 %v279_v15, 0.0 }
  0xea   : > { %v296_v23 = vmax.f32 %v274_v16, 0.0  ;;  %v300_v27 = vmax.f32 %v290_v19, 0.0 }
  0xeb   : > { %v294_v28 = vmax.f32 %v266_v20, 0.0  ;;  %v298_v31 = vmax.f32 %v282_v24, 0.0 }
  0xec   : > { %v441_v30 = vpack.c.bf16 %v296_v23, %v295_v22  ;;  %v451_v32 = vpack.c.bf16 %v300_v27, %v299_v25 }
  0xed   : > { %v436_v33 = vpack.c.bf16 %v294_v28, %v293_v26  ;;  %v446_v34 = vpack.c.bf16 %v298_v31, %v297_v29 }
  0xee   : > { %453 = vst [vmem:[%s172_s25 + $0x8] sm:$0xff] %v441_v30   ;;  %455 = vst [vmem:[%s172_s25 + $0x18] sm:$0xff] %v451_v32  }
  0xef   : > { %437 = vst [vmem:[%s172_s25] sm:$0xff] %v436_v33   ;;  %454 = vst [vmem:[%s172_s25 + $0x10] sm:$0xff] %v446_v34  }
  0xf0 PF: > { %s13_s12 = sadd.s32 1, %s493_s12  }
  0xf1   : > { %p10_p4 = scmp.ge.s32.totalorder %s13_s12, 4  }
  0xf3   :  { %12 = sbr.rel (!%p10_p4) target bundleno = 1 (0x1), region = 62 }

// kernel: _lambda_.9
= control target key start
LH: loop header
LB: loop body
LE: loop exit
PB: predicated region body
PF: predicated region fallthrough
CT: control target
= control target key end

     0   :  { %s550_s12 = smov 0   ;;  %s586_s0 = inlined_call_operand.vmem [shape: bf16[128,40], index: 0, kind: input, shape index: {}]   ;;  %s587_s1 = inlined_call_operand.vmem [shape: bf16[40,128], index: 1, kind: input, shape index: {}]   ;;  %s588_s2 = inlined_call_operand.vmem [shape: f32[1,128], index: 2, kind: input, shape index: {}]   ;;  %s589_s3 = inlined_call_operand.vmem [shape: bf16[128,128], index: 3, kind: output, shape index: {}]  }
   0x1 LB: > { %s416_s13 = sadd.s32 4294967295, %s528_s12   ;;  %p420_p0 = scmp.ge.s32.totalorder %s528_s12, 1  ;;  %s528_s12 = sphi %s550_s12, %s13_s12  }
   0x2   : > { %p138_p1 = scmp.lt.s32.totalorder %s528_s12, 3 }
   0x4   : > { %p139_p2 = pnand %p420_p0, %p138_p1 }
   0x5   : > { %v515_v0 = vld [vmem:[%s587_s1] sm:$0xff] (!%p139_p2)   ;;  %v516_v1 = vld [vmem:[%s587_s1 + $0x8] sm:$0xff] (!%p139_p2)   ;;  %s421_s18 = sshll.u32 (!%p139_p2), %s416_s13, 3  ;;  %v517_v2 = vld [vmem:[%s587_s1 + $0x10] ss:$0 sps:$4 sm:$0xff] (!%p139_p2)   ;;  %vm243_vm0 = vcmask (!%p139_p2), 1043456  }
   0x6   : > { %142 = sbr.rel (%p139_p2) target bundleno = 240 (0xf0), region = 32  ;;  %485 = vmatprep.subr.bf16.mxu0 (!%p139_p2), %v515_v0  ;;  %499 = vmatprep.subr.bf16.mxu1 (!%p139_p2), %v515_v0  ;;  %p163_p3 = scmp.lt.s32.totalorder (!%p139_p2), %s421_s18, 15  ;;  %vm230_vm1 = vcmask (!%p139_p2), 326656   ;;  %v245_v3 = vsel (!%p139_p2), %vm243_vm0, %v517_v2, 0  ;;  %v425_v8 = vld [vmem:[%s588_s2] ss:$0 sm:$0xff] (!%p139_p2) }
   0x7   : > { %486 = vmatpush3.bf16.msra.mxu0 (!%p139_p2), %v515_v0  ;;  %502 = vmatpush3.bf16.msra.mxu1 (!%p139_p2), %v515_v0 }
   0x8   : > { %487 = vmatprep.subr.bf16.mxu0 (!%p139_p2), %v516_v1  ;;  %500 = vmatprep.subr.bf16.mxu1 (!%p139_p2), %v516_v1 }
   0xb   : > { %488 = vmatpush3.bf16.msra.mxu0 (!%p139_p2), %v516_v1  ;;  %503 = vmatpush3.bf16.msra.mxu1 (!%p139_p2), %v516_v1 }
   0xc   : > { %505 = vmatprep.subr.msk.bf16.mxu0 (!%p139_p2), %vm243_vm0, %v517_v2  ;;  %506 = vmatprep.subr.msk.bf16.mxu1 (!%p139_p2), %vm243_vm0, %v517_v2 }
   0xd   : > { %s591_s18 = smov (!%p163_p3, %s421_s18), 15 }
   0xe   : > { %s422_s21 = sshll.u32 %s591_s18, 2 }
   0xf   : > { %s166_s24 = scalar_lea.vmem %s586_s0, %s422_s21  ;;  %490 = vmatpush3.bf16.msra.mxu0 %v245_v3  ;;  %504 = vmatpush3.bf16.msra.mxu1 %v245_v3  ;;  %s172_s29 = scalar_lea.vmem %s589_s3, %s422_s21 }
  0x10   : > { %v518_v4 = vld [vmem:[%s166_s24] sm:$0xff]   ;;  %v519_v5 = vld [vmem:[%s166_s24 + $0x10] sm:$0xff]   ;;  %v520_v6 = vld [vmem:[%s166_s24 + $0x8] sm:$0xff]  }
  0x11   : > { %491 = vmatprep.mubr.msk.bf16.mxu0 %vm230_vm1, %v518_v4  ;;  %v521_v7 = vld [vmem:[%s166_s24 + $0x18] sm:$0xff]   ;;  %495 = vmatprep.mubr.msk.bf16.mxu1 %vm230_vm1, %v519_v5 }
  0x12   : > { %492 = vmatmul.mubr.msk.bf16.vlgmr.msra.gmra.mrb[0].mxu0 %vm230_vm1, %v520_v6  ;;  %496 = vmatmul.mubr.msk.bf16.vlgmr.msra.gmra.mrb[0].mxu1 %vm230_vm1, %v521_v7 }
  0xe5   : > { %v493_v9 = vpop.f32.mrb[0].mxu0  ;;  %v497_v10 = vpop.f32.mrb[0].mxu1 }
  0xe6   : > { %v290_v11 = vadd.f32 %v493_v9, %v425_v8  ;;  %v306_v12 = vadd.f32 %v497_v10, %v425_v8  ;;  %v281_v13 = vpop.f32.mrb[1].mxu0  ;;  %v297_v14 = vpop.f32.mrb[1].mxu1 }
  0xe7   : > { %v282_v15 = vadd.f32 %v425_v8, %v281_v13  ;;  %v298_v16 = vadd.f32 %v425_v8, %v297_v14  ;;  %v494_v17 = vpop.f32.mrb[2].mxu0  ;;  %v498_v18 = vpop.f32.mrb[2].mxu1 }
  0xe8   : > { %v293_v19 = vadd.f32 %v494_v17, %v425_v8  ;;  %v309_v20 = vadd.f32 %v498_v18, %v425_v8  ;;  %v284_v21 = vpop.f32.mrb[3].mxu0  ;;  %v300_v22 = vpop.f32.mrb[3].mxu1  ;;  %v314_v25 = vmax.f32 %v290_v11, 0.0  ;;  %v318_v26 = vmax.f32 %v306_v12, 0.0 }
  0xe9   : > { %v285_v23 = vadd.f32 %v425_v8, %v284_v21  ;;  %v301_v24 = vadd.f32 %v425_v8, %v300_v22  ;;  %v312_v29 = vmax.f32 %v282_v15, 0.0  ;;  %v316_v30 = vmax.f32 %v298_v16, 0.0 }
  0xea   : > { %v315_v27 = vmax.f32 %v293_v19, 0.0  ;;  %v319_v28 = vmax.f32 %v309_v20, 0.0 }
  0xeb   : > { %v313_v31 = vmax.f32 %v285_v23, 0.0  ;;  %v317_v32 = vmax.f32 %v301_v24, 0.0 }
  0xec   : > { %v463_v33 = vpack.c.bf16 %v315_v27, %v314_v25  ;;  %v473_v34 = vpack.c.bf16 %v319_v28, %v318_v26 }
  0xed   : > { %v458_v35 = vpack.c.bf16 %v313_v31, %v312_v29  ;;  %v468_v36 = vpack.c.bf16 %v317_v32, %v316_v30 }
  0xee   : > { %475 = vst [vmem:[%s172_s29 + $0x8] sm:$0xff] %v463_v33   ;;  %477 = vst [vmem:[%s172_s29 + $0x18] sm:$0xff] %v473_v34  }
  0xef   : > { %459 = vst [vmem:[%s172_s29] sm:$0xff] %v458_v35   ;;  %476 = vst [vmem:[%s172_s29 + $0x10] sm:$0xff] %v468_v36  }
  0xf0 PF: > { %s13_s12 = sadd.s32 1, %s528_s12  }
  0xf1   : > { %p10_p4 = scmp.ge.s32.totalorder %s13_s12, 4  }
  0xf3   :  { %12 = sbr.rel (!%p10_p4) target bundleno = 1 (0x1), region = 62 }

// kernel: _lambda_.12
= control target key start
LH: loop header
LB: loop body
LE: loop exit
PB: predicated region body
PF: predicated region fallthrough
CT: control target
= control target key end

     0   :  { %s661_s15 = smov 0   ;;  %s698_s0 = inlined_call_operand.vmem [shape: bf16[128,40], index: 0, kind: input, shape index: {}]   ;;  %s699_s1 = inlined_call_operand.vmem [shape: bf16[40,128], index: 1, kind: input, shape index: {}]   ;;  %s700_s2 = inlined_call_operand.vmem [shape: f32[1,128], index: 2, kind: input, shape index: {}]   ;;  %s701_s3 = inlined_call_operand.vmem [shape: bf16[128,128], index: 3, kind: input, shape index: {}]   ;;  %s702_s4 = inlined_call_operand.vmem [shape: bf16[128,128], index: 4, kind: output, shape index: {}]  }
   0x1 LB: > { %s501_s16 = sadd.s32 4294967295, %s634_s15   ;;  %p505_p0 = scmp.ge.s32.totalorder %s634_s15, 1  ;;  %s634_s15 = sphi %s661_s15, %s14_s15  }
   0x2   : > { %p174_p1 = scmp.lt.s32.totalorder %s634_s15, 3 }
   0x4   : > { %p175_p2 = pnand %p505_p0, %p174_p1 }
   0x5   : > { %v621_v0 = vld [vmem:[%s699_s1] sm:$0xff] (!%p175_p2)   ;;  %v622_v1 = vld [vmem:[%s699_s1 + $0x8] sm:$0xff] (!%p175_p2)   ;;  %s506_s21 = sshll.u32 (!%p175_p2), %s501_s16, 3  ;;  %v623_v2 = vld [vmem:[%s699_s1 + $0x10] ss:$0 sps:$4 sm:$0xff] (!%p175_p2)   ;;  %vm292_vm0 = vcmask (!%p175_p2), 1043456  }
   0x6   : > { %178 = sbr.rel (%p175_p2) target bundleno = 242 (0xf2), region = 36  ;;  %591 = vmatprep.subr.bf16.mxu0 (!%p175_p2), %v621_v0  ;;  %605 = vmatprep.subr.bf16.mxu1 (!%p175_p2), %v621_v0  ;;  %p206_p3 = scmp.lt.s32.totalorder (!%p175_p2), %s506_s21, 15  ;;  %vm279_vm1 = vcmask (!%p175_p2), 326656   ;;  %v294_v3 = vsel (!%p175_p2), %vm292_vm0, %v623_v2, 0  ;;  %v512_v12 = vld [vmem:[%s700_s2] ss:$0 sm:$0xff] (!%p175_p2) }
   0x7   : > { %592 = vmatpush3.bf16.msra.mxu0 (!%p175_p2), %v621_v0  ;;  %608 = vmatpush3.bf16.msra.mxu1 (!%p175_p2), %v621_v0 }
   0x8   : > { %593 = vmatprep.subr.bf16.mxu0 (!%p175_p2), %v622_v1  ;;  %606 = vmatprep.subr.bf16.mxu1 (!%p175_p2), %v622_v1 }
   0xb   : > { %594 = vmatpush3.bf16.msra.mxu0 (!%p175_p2), %v622_v1  ;;  %609 = vmatpush3.bf16.msra.mxu1 (!%p175_p2), %v622_v1 }
   0xc   : > { %611 = vmatprep.subr.msk.bf16.mxu0 (!%p175_p2), %vm292_vm0, %v623_v2  ;;  %612 = vmatprep.subr.msk.bf16.mxu1 (!%p175_p2), %vm292_vm0, %v623_v2 }
   0xd   : > { %s704_s21 = smov (!%p206_p3, %s506_s21), 15 }
   0xe   : > { %s678_s24 = sshll.u32 %s704_s21, 2 }
   0xf   : > { %s209_s27 = scalar_lea.vmem %s698_s0, %s678_s24  ;;  %596 = vmatpush3.bf16.msra.mxu0 %v294_v3  ;;  %610 = vmatpush3.bf16.msra.mxu1 %v294_v3  ;;  %s215_s30 = scalar_lea.vmem %s701_s3, %s678_s24 }
  0x10   : > { %v624_v4 = vld [vmem:[%s209_s27] sm:$0xff]   ;;  %v625_v5 = vld [vmem:[%s209_s27 + $0x10] sm:$0xff]   ;;  %v626_v6 = vld [vmem:[%s209_s27 + $0x8] sm:$0xff]   ;;  %s221_s9 = scalar_lea.vmem %s702_s4, %s678_s24 }
  0x11   : > { %597 = vmatprep.mubr.msk.bf16.mxu0 %vm279_vm1, %v624_v4  ;;  %v627_v7 = vld [vmem:[%s209_s27 + $0x18] sm:$0xff]   ;;  %601 = vmatprep.mubr.msk.bf16.mxu1 %vm279_vm1, %v625_v5  ;;  %v578_v8 = vld [vmem:[%s215_s30 + $0x8] sm:$0xff]   ;;  %v543_v10 = vld [vmem:[%s215_s30] sm:$0xff]  }
  0x12   : > { %598 = vmatmul.mubr.msk.bf16.vlgmr.msra.gmra.mrb[0].mxu0 %vm279_vm1, %v626_v6  ;;  %602 = vmatmul.mubr.msk.bf16.vlgmr.msra.gmra.mrb[0].mxu1 %vm279_vm1, %v627_v7  ;;  %v580_v9 = vld [vmem:[%s215_s30 + $0x18] sm:$0xff]   ;;  %v579_v11 = vld [vmem:[%s215_s30 + $0x10] sm:$0xff]   ;;  %v548_v14 = vunpack.c.l.bf16 %v578_v8  ;;  %v544_v17 = vunpack.c.l.bf16 %v543_v10  ;;  %v549_v23 = vunpack.c.h.bf16 %v578_v8  ;;  %v545_v29 = vunpack.c.h.bf16 %v543_v10 }
  0x13   : > { %v556_v16 = vunpack.c.l.bf16 %v580_v9  ;;  %v552_v18 = vunpack.c.l.bf16 %v579_v11  ;;  %v557_v24 = vunpack.c.h.bf16 %v580_v9  ;;  %v553_v30 = vunpack.c.h.bf16 %v579_v11 }
  0xe5   : > { %v599_v13 = vpop.f32.mrb[0].mxu0  ;;  %v603_v15 = vpop.f32.mrb[0].mxu1 }
  0xe6   : > { %v339_v19 = vadd.f32 %v599_v13, %v512_v12  ;;  %v355_v20 = vadd.f32 %v603_v15, %v512_v12  ;;  %v330_v21 = vpop.f32.mrb[1].mxu0  ;;  %v346_v22 = vpop.f32.mrb[1].mxu1 }
  0xe7   : > { %v331_v25 = vadd.f32 %v512_v12, %v330_v21  ;;  %v347_v26 = vadd.f32 %v512_v12, %v346_v22  ;;  %v600_v27 = vpop.f32.mrb[2].mxu0  ;;  %v604_v28 = vpop.f32.mrb[2].mxu1 }
  0xe8   : > { %v363_v31 = vmax.f32 %v339_v19, 0.0  ;;  %v367_v32 = vmax.f32 %v355_v20, 0.0  ;;  %v342_v33 = vadd.f32 %v600_v27, %v512_v12  ;;  %v358_v34 = vadd.f32 %v604_v28, %v512_v12  ;;  %v333_v35 = vpop.f32.mrb[3].mxu0  ;;  %v349_v36 = vpop.f32.mrb[3].mxu1 }
  0xe9   : > { %v361_v37 = vmax.f32 %v331_v25, 0.0  ;;  %v365_v38 = vmax.f32 %v347_v26, 0.0  ;;  %v334_v39 = vadd.f32 %v512_v12, %v333_v35  ;;  %v350_v40 = vadd.f32 %v512_v12, %v349_v36 }
  0xea   : > { %v364_v41 = vmax.f32 %v342_v33, 0.0  ;;  %v368_v42 = vmax.f32 %v358_v34, 0.0  ;;  %v387_v45 = vadd.f32 %v548_v14, %v363_v31  ;;  %v391_v46 = vadd.f32 %v556_v16, %v367_v32 }
  0xeb   : > { %v362_v43 = vmax.f32 %v334_v39, 0.0  ;;  %v366_v44 = vmax.f32 %v350_v40, 0.0  ;;  %v385_v49 = vadd.f32 %v544_v17, %v361_v37  ;;  %v389_v50 = vadd.f32 %v552_v18, %v365_v38 }
  0xec   : > { %v388_v47 = vadd.f32 %v549_v23, %v364_v41  ;;  %v392_v48 = vadd.f32 %v557_v24, %v368_v42 }
  0xed   : > { %v386_v51 = vadd.f32 %v545_v29, %v362_v43  ;;  %v390_v52 = vadd.f32 %v553_v30, %v366_v44 }
  0xee   : > { %v566_v53 = vpack.c.bf16 %v388_v47, %v387_v45  ;;  %v576_v54 = vpack.c.bf16 %v392_v48, %v391_v46 }
  0xef   : > { %v561_v55 = vpack.c.bf16 %v386_v51, %v385_v49  ;;  %v571_v56 = vpack.c.bf16 %v390_v52, %v389_v50 }
  0xf0   : > { %581 = vst [vmem:[%s221_s9 + $0x8] sm:$0xff] %v566_v53   ;;  %583 = vst [vmem:[%s221_s9 + $0x18] sm:$0xff] %v576_v54  }
  0xf1   : > { %562 = vst [vmem:[%s221_s9] sm:$0xff] %v561_v55   ;;  %582 = vst [vmem:[%s221_s9 + $0x10] sm:$0xff] %v571_v56  }
  0xf2 PF: > { %s14_s15 = sadd.s32 1, %s634_s15  }
  0xf3   : > { %p11_p4 = scmp.ge.s32.totalorder %s14_s15, 4  }
  0xf5   :  { %13 = sbr.rel (!%p11_p4) target bundleno = 1 (0x1), region = 69 }

// kernel: _lambda_.15
= control target key start
LH: loop header
LB: loop body
LE: loop exit
PB: predicated region body
PF: predicated region fallthrough
CT: control target
= control target key end

     0   :  { %s694_s18 = smov 0   ;;  %s745_s0 = inlined_call_operand.vmem [shape: bf16[128,8], index: 0, kind: input, shape index: {}]   ;;  %s746_s1 = inlined_call_operand.vmem [shape: bf16[128,8], index: 1, kind: input, shape index: {}]   ;;  %s747_s2 = inlined_call_operand.vmem [shape: bf16[8,128], index: 2, kind: input, shape index: {}]   ;;  %s748_s3 = inlined_call_operand.vmem [shape: bf16[8,128], index: 3, kind: input, shape index: {}]   ;;  %s749_s4 = inlined_call_operand.vmem [shape: f32[1,128], index: 4, kind: input, shape index: {}]   ;;  %s750_s5 = inlined_call_operand.vmem [shape: f32[128,128], index: 5, kind: output, shape index: {}]  }
   0x1 LB: > { %s570_s19 = sadd.s32 4294967295, %s662_s18   ;;  %p574_p0 = scmp.ge.s32.totalorder %s662_s18, 1  ;;  %s662_s18 = sphi %s694_s18, %s15_s18  }
   0x2   : > { %p199_p1 = scmp.lt.s32.totalorder %s662_s18, 3 }
   0x4   : > { %p200_p2 = pnand %p574_p0, %p199_p1 }
   0x5   : > { %v268_v0 = vld [vmem:[%s748_s3] sm:$0xf] (!%p200_p2)  ;;  %vm302_vm0 = vcmask (!%p200_p2), 1043456   ;;  %s575_s24 = sshll.u32 (!%p200_p2), %s570_s19, 3  ;;  %vm289_vm1 = vcmask (!%p200_p2), 64512  }
   0x6   : > { %203 = sbr.rel (%p200_p2) target bundleno = 249 (0xf9), region = 40  ;;  %v259_v1 = vld [vmem:[%s747_s2] sm:$0xf] (!%p200_p2)  ;;  %638 = vmatprep.subr.msk.bf16.mxu1 (!%p200_p2), %vm302_vm0, %v268_v0  ;;  %v304_v2 = vsel (!%p200_p2), %vm302_vm0, %v268_v0, 0  ;;  %p233_p3 = scmp.lt.s32.totalorder (!%p200_p2), %s575_s24, 15 }
   0x7   : > { %639 = vmatprep.subr.msk.bf16.mxu0 (!%p200_p2), %vm302_vm0, %v259_v1  ;;  %v404_v3 = vsel (!%p200_p2), %vm302_vm0, %v259_v1, 0  ;;  %611 = vmatpush3.bf16.msra.mxu1 (!%p200_p2), %v304_v2  ;;  %v597_v14 = vld [vmem:[%s749_s4] ss:$0 sm:$0xff] (!%p200_p2) }
   0x8   : > { %621 = vmatpush3.bf16.msra.mxu0 (!%p200_p2), %v404_v3 }
   0xd   : > { %s752_s24 = smov (!%p233_p3, %s575_s24), 15 }
   0xe   : > { %s576_s25 = sshll.u32 %s752_s24, 2  ;;  %s580_s9 = sshll.u32 %s752_s24, 3 }
   0xf   : > { %s242_s28 = scalar_lea.vmem %s746_s1, %s576_s25  ;;  %s236_s6 = scalar_lea.vmem %s745_s0, %s576_s25 }
  0x10   : > { %v648_v4 = vld [vmem:[%s242_s28] sm:$0xff]   ;;  %v650_v6 = vld [vmem:[%s242_s28 + $0x8] sm:$0xff]   ;;  %v652_v8 = vld [vmem:[%s242_s28 + $0x10] sm:$0xff]   ;;  %s732_s12 = scalar_lea.vmem %s750_s5, %s580_s9 }
  0x11   : > { %v649_v5 = vld [vmem:[%s236_s6] sm:$0xff]   ;;  %612 = vmatprep.mubr.msk.bf16.mxu1 %vm289_vm1, %v648_v4  ;;  %v651_v7 = vld [vmem:[%s236_s6 + $0x8] sm:$0xff]   ;;  %v653_v9 = vld [vmem:[%s236_s6 + $0x10] sm:$0xff]  }
  0x12   : > { %622 = vmatprep.mubr.msk.bf16.mxu0 %vm289_vm1, %v649_v5  ;;  %613 = vmatmul.mubr.msk.bf16.vlgmr.msra.gmra.mrb[0].mxu1 %vm289_vm1, %v650_v6  ;;  %v654_v10 = vld [vmem:[%s242_s28 + $0x18] sm:$0xff]  }
  0x13   : > { %623 = vmatmul.mubr.msk.bf16.vlgmr.msra.gmra.mrb[0].mxu0 %vm289_vm1, %v651_v7  ;;  %616 = vmatprep.mubr.msk.bf16.mxu1 %vm289_vm1, %v652_v8  ;;  %v655_v11 = vld [vmem:[%s236_s6 + $0x18] sm:$0xff]  }
  0x14   : > { %626 = vmatprep.mubr.msk.bf16.mxu0 %vm289_vm1, %v653_v9 }
  0x1a   : > { %617 = vmatmul.mubr.msk.bf16.gmra.mrb[4].mxu1 %vm289_vm1, %v654_v10 }
  0x1b   : > { %627 = vmatmul.mubr.msk.bf16.gmra.mrb[4].mxu0 %vm289_vm1, %v655_v11 }
  0xe5   : > { %v614_v12 = vpop.f32.mrb[0].mxu1 }
  0xe6   : > { %v624_v13 = vpop.f32.mrb[0].mxu0  ;;  %v340_v15 = vpop.f32.mrb[1].mxu1 }
  0xe7   : > { %v449_v16 = vadd.f32 %v624_v13, %v614_v12  ;;  %v440_v17 = vpop.f32.mrb[1].mxu0  ;;  %v615_v18 = vpop.f32.mrb[2].mxu1 }
  0xe8   : > { %v441_v19 = vadd.f32 %v440_v17, %v340_v15  ;;  %v625_v20 = vpop.f32.mrb[2].mxu0  ;;  %v343_v21 = vpop.f32.mrb[3].mxu1 }
  0xe9   : > { %v480_v22 = vadd.f32 %v597_v14, %v449_v16  ;;  %v452_v23 = vadd.f32 %v625_v20, %v615_v18  ;;  %v443_v24 = vpop.f32.mrb[3].mxu0 }
  0xea   : > { %v478_v25 = vadd.f32 %v597_v14, %v441_v19  ;;  %v444_v26 = vadd.f32 %v443_v24, %v343_v21 }
  0xeb   : > { %v488_v27 = vmax.f32 %v480_v22, 0.0  ;;  %v481_v28 = vadd.f32 %v597_v14, %v452_v23 }
  0xec   : > { %v486_v29 = vmax.f32 %v478_v25, 0.0  ;;  %v479_v30 = vadd.f32 %v597_v14, %v444_v26 }
  0xed   : > { %496 = vst [vmem:[%s732_s12 + $0x10] sm:$0xff] %v488_v27  ;;  %v489_v31 = vmax.f32 %v481_v28, 0.0  ;;  %v618_v32 = vpop.f32.mrb[4].mxu1 }
  0xee   : > { %494 = vst [vmem:[%s732_s12] sm:$0xff] %v486_v29  ;;  %v487_v33 = vmax.f32 %v479_v30, 0.0  ;;  %v628_v34 = vpop.f32.mrb[4].mxu0  ;;  %v356_v35 = vpop.f32.mrb[5].mxu1 }
  0xef   : > { %497 = vst [vmem:[%s732_s12 + $0x18] sm:$0xff] %v489_v31  ;;  %v465_v36 = vadd.f32 %v628_v34, %v618_v32  ;;  %v456_v37 = vpop.f32.mrb[5].mxu0  ;;  %v619_v38 = vpop.f32.mrb[6].mxu1 }
  0xf0   : > { %495 = vst [vmem:[%s732_s12 + $0x8] sm:$0xff] %v487_v33  ;;  %v457_v39 = vadd.f32 %v456_v37, %v356_v35  ;;  %v629_v40 = vpop.f32.mrb[6].mxu0  ;;  %v359_v41 = vpop.f32.mrb[7].mxu1 }
  0xf1   : > { %v484_v42 = vadd.f32 %v597_v14, %v465_v36  ;;  %v468_v43 = vadd.f32 %v629_v40, %v619_v38  ;;  %v459_v44 = vpop.f32.mrb[7].mxu0 }
  0xf2   : > { %v482_v45 = vadd.f32 %v597_v14, %v457_v39  ;;  %v460_v46 = vadd.f32 %v459_v44, %v359_v41 }
  0xf3   : > { %v492_v47 = vmax.f32 %v484_v42, 0.0  ;;  %v485_v48 = vadd.f32 %v597_v14, %v468_v43 }
  0xf4   : > { %v490_v49 = vmax.f32 %v482_v45, 0.0  ;;  %v483_v50 = vadd.f32 %v597_v14, %v460_v46 }
  0xf5   : > { %500 = vst [vmem:[%s732_s12 + $0x30] sm:$0xff] %v492_v47  ;;  %v493_v51 = vmax.f32 %v485_v48, 0.0 }
  0xf6   : > { %498 = vst [vmem:[%s732_s12 + $0x20] sm:$0xff] %v490_v49  ;;  %v491_v52 = vmax.f32 %v483_v50, 0.0 }
  0xf7   : > { %501 = vst [vmem:[%s732_s12 + $0x38] sm:$0xff] %v493_v51 }
  0xf8   : > { %499 = vst [vmem:[%s732_s12 + $0x28] sm:$0xff] %v491_v52 }
  0xf9 PF: > { %s15_s18 = sadd.s32 1, %s662_s18  }
  0xfa   : > { %p12_p4 = scmp.ge.s32.totalorder %s15_s18, 4  }
  0xfc   :  { %14 = sbr.rel (!%p12_p4) target bundleno = 1 (0x1), region = 73 }

</bundles_post_ra>
